<compile_context>
chip_gen: v7x
topology: tpu7x:2x2x1
jax: 0.10.0
libtpu: 0.0.40
codegen_flags: <defaults>
</compile_context>

<pallas_src>
import jax
import jax.numpy as jnp
from jax.experimental import pallas as pl
from jax.experimental.pallas import tpu as pltpu

RANK_VOCAB, RANK_DIM = 14, 8
SUIT_VOCAB, SUIT_DIM = 5, 4
OUT_DIM = RANK_DIM + SUIT_DIM          # 12
GROUP = 32                             # cards packed into one lane-dense output row
SLOT = 24                              # per-card one-hot slots (19 used, padded to mult of 8)
LANE_IN = GROUP * SLOT                 # 768
LANE_OUT = GROUP * OUT_DIM             # 384
TILE_R_MAX = 256                       # rows per grid step -> 8192 cards / tile


def _round_up(x, m):
    return (x + m - 1) // m * m


def _card_embedding_kernel(cards_ref, expand_ref, mask_ref, target_ref,
                           table_ref, out_ref):
    # cards_ref : (TR, 32)   int32  raw card codes (32 cards per output row)
    # expand_ref: (32, 768)  f32    expand[c, j] = (c == j // 24)
    # mask_ref  : (1, 768)   int32  0xFF00 on rank slots, 0x00FF on suit slots, 0 on pad
    # target_ref: (1, 768)   int32  slot<<8 on rank slots, slot-14 on suit slots, -1 on pad
    # table_ref : (768, 384) f32    kron(I_32, fused(24,12)) block-diagonal table
    # out_ref   : (TR, 384)  f32    32 cards x 12 dims per row (lane-dense store)
    cards = cards_ref[...]
    valid = (cards >= 0) & (cards < 52)
    rank = jnp.where(valid, cards >> 2, RANK_VOCAB - 1)
    suit = jnp.where(valid, cards & 3, SUIT_VOCAB - 1)
    packed = (rank * 256 + suit).astype(jnp.float32)          # (TR, 32), exact small ints

    # Replicate each card's packed (rank,suit) code across its 24 one-hot slots
    # with a tiny MXU matmul (avoids unsupported lane-gather / in-kernel reshape).
    rep = jnp.dot(packed, expand_ref[...],
                  preferred_element_type=jnp.float32)         # (TR, 768)
    rep_i = (rep + 0.5).astype(jnp.int32)                     # exact round back to int

    # Positioned one-hot: two 1s per card (its rank slot + its suit slot) inside
    # its own 24-lane group.  Pad slots never match (mask 0 vs target -1).
    onehot = ((rep_i & mask_ref[...]) == target_ref[...]).astype(jnp.float32)

    # Single fused lookup -> lane-dense (TR, 384) tile, one unmasked store path.
    out_ref[...] = jnp.dot(onehot, table_ref[...],
                           preferred_element_type=jnp.float32)


def _build_constants(rank_table, suit_table):
    # fused (24, 12): rows 0..13 carry rank emb in cols 0..7,
    #                 rows 14..18 carry suit emb in cols 8..11, rest zero.
    fused = jnp.zeros((SLOT, OUT_DIM), jnp.float32)
    fused = fused.at[:RANK_VOCAB, :RANK_DIM].set(rank_table.astype(jnp.float32))
    fused = fused.at[RANK_VOCAB:RANK_VOCAB + SUIT_VOCAB, RANK_DIM:].set(
        suit_table.astype(jnp.float32))
    eye = jnp.eye(GROUP, dtype=jnp.float32)
    table = jnp.kron(eye, fused)                                  # (768, 384)
    expand = jnp.kron(eye, jnp.ones((1, SLOT), jnp.float32))      # (32, 768)

    slot = jnp.arange(SLOT, dtype=jnp.int32)
    mask_slot = jnp.where(slot < RANK_VOCAB, 0xFF00,
                          jnp.where(slot < RANK_VOCAB + SUIT_VOCAB, 0x00FF, 0))
    target_slot = jnp.where(slot < RANK_VOCAB, slot << 8,
                            jnp.where(slot < RANK_VOCAB + SUIT_VOCAB,
                                      slot - RANK_VOCAB, -1))
    mask_row = jnp.tile(mask_slot, GROUP).reshape(1, LANE_IN).astype(jnp.int32)
    target_row = jnp.tile(target_slot, GROUP).reshape(1, LANE_IN).astype(jnp.int32)
    return expand, mask_row, target_row, table


def card_embedding(cards, rank_table, suit_table):
    """cards: (N,) int card codes (rank=code//4, suit=code%4; invalid -> (13,4)).
    Returns (N, 12) float32."""
    cards = cards.astype(jnp.int32)
    n = cards.shape[0]

    r_needed = -(-n // GROUP)                        # rows of 32 cards
    tile_r = min(TILE_R_MAX, _round_up(r_needed, 8))
    r_total = _round_up(r_needed, tile_r)
    n_pad = r_total * GROUP

    cards_pad = jnp.pad(cards, (0, n_pad - n), constant_values=-1)
    cards2d = cards_pad.reshape(r_total, GROUP)

    expand, mask_row, target_row, table = _build_constants(rank_table, suit_table)

    out2d = pl.pallas_call(
        _card_embedding_kernel,
        out_shape=jax.ShapeDtypeStruct((r_total, LANE_OUT), jnp.float32),
        grid_spec=pltpu.PrefetchScalarGridSpec(
            num_scalar_prefetch=0,
            grid=(r_total // tile_r,),
            in_specs=[
                pl.BlockSpec((tile_r, GROUP), lambda i: (i, 0)),
                pl.BlockSpec((GROUP, LANE_IN), lambda i: (0, 0)),
                pl.BlockSpec((1, LANE_IN), lambda i: (0, 0)),
                pl.BlockSpec((1, LANE_IN), lambda i: (0, 0)),
                pl.BlockSpec((LANE_IN, LANE_OUT), lambda i: (0, 0)),
            ],
            out_specs=pl.BlockSpec((tile_r, LANE_OUT), lambda i: (i, 0)),
        ),
        compiler_params=pltpu.CompilerParams(
            dimension_semantics=("parallel",)),
    )(cards2d, expand, mask_row, target_row, table)

    # (r_total, 384) and (n_pad, 12) are the same row-major bytes: free reshape.
    return out2d.reshape(n_pad, OUT_DIM)[:n]


def reference(cards, rank_table, suit_table):
    cards = cards.astype(jnp.int32)
    valid = (cards >= 0) & (cards < 52)
    ranks = jnp.where(valid, cards // 4, RANK_VOCAB - 1)
    suits = jnp.where(valid, cards % 4, SUIT_VOCAB - 1)
    return jnp.concatenate([rank_table[ranks], suit_table[suits]], axis=-1)


if __name__ == "__main__":
    key = jax.random.PRNGKey(0)
    k_rank, k_suit, k_cards = jax.random.split(key, 3)

    # Deterministic synthetic parameters (nn.Embedding default init ~ N(0, 1)).
    rank_table = jax.random.normal(k_rank, (RANK_VOCAB, RANK_DIM), dtype=jnp.float32)
    suit_table = jax.random.normal(k_suit, (SUIT_VOCAB, SUIT_DIM), dtype=jnp.float32)

    # Small batch, deliberately NOT a multiple of 32, with invalid codes to
    # exercise the (rank 13, suit 4) fallback path from the PyTorch try/except.
    n_cards = 50
    cards = jax.random.randint(k_cards, (n_cards,), 0, 52, dtype=jnp.int32)
    cards = cards.at[3].set(-1)
    cards = cards.at[40].set(99)

    out = jax.block_until_ready(card_embedding(cards, rank_table, suit_table))
    ref = reference(cards, rank_table, suit_table)

    assert out.shape == (n_cards, OUT_DIM), out.shape
    assert jnp.allclose(out, ref, atol=1e-5), "mismatch vs reference"

    # TODO(synk): Card.get_rank_int / get_suit_int bitmask/string parsing is
    # host-side Python in the original module; card codes here are plain ints.
    print("KERNEL_OK")
</pallas_src>

<mosaic_0001>
module attributes {stable_mosaic.version = 11 : i64} {
  func.func @_card_embedding_kernel(%arg0: i32, %arg1: memref<8x32xi32, #tpu.memory_space<vmem>>, %arg2: memref<32x768xf32, #tpu.memory_space<vmem>>, %arg3: memref<1x768xi32, #tpu.memory_space<vmem>>, %arg4: memref<1x768xi32, #tpu.memory_space<vmem>>, %arg5: memref<768x384xf32, #tpu.memory_space<vmem>>, %arg6: memref<8x384xf32, #tpu.memory_space<vmem>>) attributes {dimension_semantics = [#tpu.dimension_semantics<parallel>], iteration_bounds = array<i64: 1>, scalar_prefetch = 0 : i64, scratch_operands = 0 : i64, tpu.core_type = #tpu.core_type<tc>, window_params = [{transform_indices = @transform_0, window_bounds = array<i64: 8, 32>}, {pipeline_mode = #tpu.pipeline_mode<synchronous>, transform_indices = @transform_1, window_bounds = array<i64: 32, 768>}, {pipeline_mode = #tpu.pipeline_mode<synchronous>, transform_indices = @transform_2, window_bounds = array<i64: 1, 768>}, {pipeline_mode = #tpu.pipeline_mode<synchronous>, transform_indices = @transform_3, window_bounds = array<i64: 1, 768>}, {pipeline_mode = #tpu.pipeline_mode<synchronous>, transform_indices = @transform_4, window_bounds = array<i64: 768, 384>}, {transform_indices = @transform_5, window_bounds = array<i64: 8, 384>}]} {
    %c0 = arith.constant 0 : index
    %c0_0 = arith.constant 0 : index
    %0 = vector.load %arg1[%c0, %c0_0] : memref<8x32xi32, #tpu.memory_space<vmem>>, vector<8x32xi32>
    %c0_i32 = arith.constant 0 : i32
    %1 = vector.broadcast %c0_i32 : i32 to vector<8x32xi32>
    %2 = arith.cmpi sge, %0, %1 : vector<8x32xi32>
    %c52_i32 = arith.constant 52 : i32
    %3 = vector.broadcast %c52_i32 : i32 to vector<8x32xi32>
    %4 = arith.cmpi slt, %0, %3 : vector<8x32xi32>
    %5 = arith.andi %2, %4 : vector<8x32xi1>
    %c2_i32 = arith.constant 2 : i32
    %6 = vector.broadcast %c2_i32 : i32 to vector<8x32xi32>
    %7 = arith.shrsi %0, %6 : vector<8x32xi32>
    %c13_i32 = arith.constant 13 : i32
    %8 = vector.broadcast %c13_i32 : i32 to vector<8x32xi32>
    %9 = arith.select %5, %7, %8 : vector<8x32xi1>, vector<8x32xi32>
    %c3_i32 = arith.constant 3 : i32
    %10 = vector.broadcast %c3_i32 : i32 to vector<8x32xi32>
    %11 = arith.andi %0, %10 : vector<8x32xi32>
    %c4_i32 = arith.constant 4 : i32
    %12 = vector.broadcast %c4_i32 : i32 to vector<8x32xi32>
    %13 = arith.select %5, %11, %12 : vector<8x32xi1>, vector<8x32xi32>
    %c256_i32 = arith.constant 256 : i32
    %14 = vector.broadcast %c256_i32 : i32 to vector<8x32xi32>
    %15 = arith.muli %9, %14 : vector<8x32xi32>
    %16 = arith.addi %15, %13 : vector<8x32xi32>
    %17 = arith.sitofp %16 : vector<8x32xi32> to vector<8x32xf32>
    %c0_1 = arith.constant 0 : index
    %c0_2 = arith.constant 0 : index
    %18 = vector.load %arg2[%c0_1, %c0_2] : memref<32x768xf32, #tpu.memory_space<vmem>>, vector<32x768xf32>
    %cst = arith.constant dense<0.000000e+00> : vector<8x768xf32>
    %19 = tpu.matmul %17, %18, %cst {dimension_numbers = #tpu.dot_dimension_numbers<[1], [0], [0], [1], [0, 0, 1, 1], [], []>} : vector<8x32xf32>, vector<32x768xf32>, vector<8x768xf32> -> vector<8x768xf32>
    %cst_3 = arith.constant 5.000000e-01 : f32
    %20 = vector.broadcast %cst_3 : f32 to vector<8x768xf32>
    %21 = arith.addf %19, %20 : vector<8x768xf32>
    %22 = arith.fptosi %21 : vector<8x768xf32> to vector<8x768xi32>
    %c0_4 = arith.constant 0 : index
    %c0_5 = arith.constant 0 : index
    %23 = vector.load %arg3[%c0_4, %c0_5] : memref<1x768xi32, #tpu.memory_space<vmem>>, vector<1x768xi32>
    %24 = vector.broadcast %23 : vector<1x768xi32> to vector<8x768xi32>
    %25 = arith.andi %22, %24 : vector<8x768xi32>
    %c0_6 = arith.constant 0 : index
    %c0_7 = arith.constant 0 : index
    %26 = vector.load %arg4[%c0_6, %c0_7] : memref<1x768xi32, #tpu.memory_space<vmem>>, vector<1x768xi32>
    %27 = vector.broadcast %26 : vector<1x768xi32> to vector<8x768xi32>
    %28 = arith.cmpi eq, %25, %27 : vector<8x768xi32>
    %29 = arith.extui %28 : vector<8x768xi1> to vector<8x768xi32>
    %30 = arith.sitofp %29 : vector<8x768xi32> to vector<8x768xf32>
    %c0_8 = arith.constant 0 : index
    %c0_9 = arith.constant 0 : index
    %31 = vector.load %arg5[%c0_8, %c0_9] : memref<768x384xf32, #tpu.memory_space<vmem>>, vector<768x384xf32>
    %cst_10 = arith.constant dense<0.000000e+00> : vector<8x384xf32>
    %32 = tpu.matmul %30, %31, %cst_10 {dimension_numbers = #tpu.dot_dimension_numbers<[1], [0], [0], [1], [0, 0, 1, 1], [], []>} : vector<8x768xf32>, vector<768x384xf32>, vector<8x384xf32> -> vector<8x384xf32>
    %c0_11 = arith.constant 0 : index
    %c0_12 = arith.constant 0 : index
    %33 = vector.load %arg6[%c0_11, %c0_12] : memref<8x384xf32, #tpu.memory_space<vmem>>, vector<8x384xf32>
    tpu.vector_store %arg6[%c0_11, %c0_12], %32 {strides = array<i32>} : memref<8x384xf32, #tpu.memory_space<vmem>>, vector<8x384xf32>,
    return
  }
  func.func @transform_0(%arg0: i32) -> (i32, i32) {
    %c0_i32 = arith.constant 0 : i32
    %c0_i32_0 = arith.constant 0 : i32
    return %arg0, %c0_i32 : i32, i32
  }
  func.func @transform_1(%arg0: i32) -> (i32, i32) {
    %c0_i32 = arith.constant 0 : i32
    %c0_i32_0 = arith.constant 0 : i32
    %c0_i32_1 = arith.constant 0 : i32
    return %c0_i32, %c0_i32_0 : i32, i32
  }
  func.func @transform_2(%arg0: i32) -> (i32, i32) {
    %c0_i32 = arith.constant 0 : i32
    %c0_i32_0 = arith.constant 0 : i32
    %c0_i32_1 = arith.constant 0 : i32
    return %c0_i32, %c0_i32_0 : i32, i32
  }
  func.func @transform_3(%arg0: i32) -> (i32, i32) {
    %c0_i32 = arith.constant 0 : i32
    %c0_i32_0 = arith.constant 0 : i32
    %c0_i32_1 = arith.constant 0 : i32
    return %c0_i32, %c0_i32_0 : i32, i32
  }
  func.func @transform_4(%arg0: i32) -> (i32, i32) {
    %c0_i32 = arith.constant 0 : i32
    %c0_i32_0 = arith.constant 0 : i32
    %c0_i32_1 = arith.constant 0 : i32
    return %c0_i32, %c0_i32_0 : i32, i32
  }
  func.func @transform_5(%arg0: i32) -> (i32, i32) {
    %c0_i32 = arith.constant 0 : i32
    %c0_i32_0 = arith.constant 0 : i32
    return %arg0, %c0_i32 : i32, i32
  }
}

</mosaic_0001>

<bundles_post_ra>
// kernel: tpu_custom_call.1
= control target key start
LH: loop header
LB: loop body
LE: loop exit
PB: predicated region body
PF: predicated region fallthrough
CT: control target
= control target key end

     0   :  { %10 = vsyncpa [#allocation3], 0  ;;  %s1964_s0 = inlined_call_operand.hbm [shape: s32[8,32], index: 0, kind: input, shape index: {}]   ;;  %s1965_s1 = inlined_call_operand.hbm [shape: f32[32,768], index: 1, kind: input, shape index: {}]   ;;  %s1966_s2 = inlined_call_operand.hbm [shape: s32[1,768], index: 2, kind: input, shape index: {}]   ;;  %s1967_s3 = inlined_call_operand.hbm [shape: s32[1,768], index: 3, kind: input, shape index: {}]   ;;  %s1968_s4 = inlined_call_operand.hbm [shape: f32[768,384], index: 4, kind: input, shape index: {}]   ;;  %s1969_s5 = inlined_call_operand.hbm [shape: f32[8,384], index: 5, kind: output, shape index: {}]  }
   0x1   :  { %11 = vsyncpa [#allocation6], 0 }
   0x2   :  { %12 = vsyncpa [#allocation9], 0 }
   0x3   :  { %13 = vsyncpa [#allocation4], 0  ;;  %s1752_s18 = smov [#allocation5]   ;;  %s1612_s22 = scalar_lea.hbm %s1965_s1, 3072 }
   0x4   :  { %s29_s19 = sshll.u32 %s1752_s18, 4  ;;  %p1613_p0 = scmp.ne.s32.totalorder %s1965_s1, %s1612_s22  ;;  %s30_s19 = int_to_ptr.vmem [resolvable:$true] %s29_s19 }
   0x5   :  { %p1616_p1 = scmp.lt.u32.totalorder %s1612_s22, %s1965_s1 }
   0x7   :  { %p1618_p2 = pnand %p1616_p1, %p1613_p0 }
   0x9   :  { %1621 = shalt.err (!%p1618_p2)
}
   0xa   :  { %s1622_s27 = scalar_lea.vmem %s30_s19, 3072  ;;  %p1627_p4 = scmp.lt.s32.totalorder %s30_s19, %s30_s19 }
   0xb   :  { %p1623_p3 = scmp.ne.s32.totalorder %s30_s19, %s1622_s27  ;;  %p1628_p5 = scmp.lt.s32.totalorder %s1622_s27, %s1622_s27 }
   0xd   :  { %p1629_p6 = por %p1628_p5, %p1627_p4 }
   0xf   :  { %p1630_p7 = pnand %p1629_p6, %p1623_p3 }
  0x11   :  { %1633 = shalt.err (!%p1630_p7)
}
  0x12   :  { %s1753_s28 = smov 768   ;;  %s1754_s29 = smov 48  }
  0x13   :  { %35 = dma.hbm_to_vmem [thread:$0]  %s1965_s1, 3072, %s30_s19, [#allocation6], %s1753_s28, %s1753_s28, %s1754_s29  }
  0x14   :  { %s1755_s7 = smov [#allocation8]   ;;  %s1756_s9 = smov [#allocation2]  }
  0x15   :  { %s52_s8 = sshll.u32 %s1755_s7, 4  ;;  %s20_s10 = sshll.u32 %s1756_s9, 4  ;;  %s53_s8 = int_to_ptr.vmem [resolvable:$true] %s52_s8  ;;  %s21_s10 = int_to_ptr.vmem [resolvable:$true] %s20_s10 }
  0x16   :  { %s1634_s13 = scalar_lea.hbm %s1967_s3, 96 }
  0x17   :  { %p1635_p8 = scmp.ne.s32.totalorder %s1967_s3, %s1634_s13  ;;  %p1638_p9 = scmp.lt.u32.totalorder %s1634_s13, %s1967_s3 }
  0x19   :  { %p1640_p10 = pnand %p1638_p9, %p1635_p8 }
  0x1b   :  { %1643 = shalt.err (!%p1640_p10)
}
  0x1c   :  { %s1644_s1 = scalar_lea.vmem %s53_s8, 96  ;;  %p1649_p12 = scmp.lt.s32.totalorder %s53_s8, %s53_s8 }
  0x1d   :  { %p1645_p11 = scmp.ne.s32.totalorder %s53_s8, %s1644_s1  ;;  %p1650_p13 = scmp.lt.s32.totalorder %s1644_s1, %s1644_s1 }
  0x1f   :  { %p1651_p0 = por %p1650_p13, %p1649_p12 }
  0x21   :  { %p1652_p1 = pnand %p1651_p0, %p1645_p11 }
  0x23   :  { %1655 = shalt.err (!%p1652_p1)
}
  0x24   :  { %55 = dma.hbm_to_vmem [thread:$0]  %s1967_s3, 96, %s53_s8, [#allocation9]  }
  0x25   :  { %s1656_s22 = scalar_lea.hbm %s1964_s0, 128 }
  0x26   :  { %p1657_p2 = scmp.ne.s32.totalorder %s1964_s0, %s1656_s22  ;;  %p1660_p3 = scmp.lt.u32.totalorder %s1656_s22, %s1964_s0 }
  0x28   :  { %p1662_p4 = pnand %p1660_p3, %p1657_p2 }
  0x2a   :  { %1665 = shalt.err (!%p1662_p4)
}
  0x2b   :  { %s1666_s27 = scalar_lea.vmem %s21_s10, 128  ;;  %p1671_p6 = scmp.lt.s32.totalorder %s21_s10, %s21_s10 }
  0x2c   :  { %p1667_p5 = scmp.ne.s32.totalorder %s21_s10, %s1666_s27  ;;  %p1672_p7 = scmp.lt.s32.totalorder %s1666_s27, %s1666_s27 }
  0x2e   :  { %p1673_p8 = por %p1672_p7, %p1671_p6 }
  0x30   :  { %p1674_p9 = pnand %p1673_p8, %p1667_p5 }
  0x32   :  { %1677 = shalt.err (!%p1674_p9)
}
  0x33   :  { %23 = dma.hbm_to_vmem [thread:$0]  %s1964_s0, 128, %s21_s10, [#allocation3]  }
  0x34   :  { %s1757_s29 = smov [#allocation7]   ;;  %s1758_s6 = smov [#allocation10]  }
  0x35   :  { %s42_s30 = sshll.u32 %s1757_s29, 4  ;;  %s61_s7 = sshll.u32 %s1758_s6, 4  ;;  %s43_s30 = int_to_ptr.vmem [resolvable:$true] %s42_s30  ;;  %s62_s7 = int_to_ptr.vmem [resolvable:$true] %s61_s7 }
  0x36   :  { %s1678_s11 = scalar_lea.hbm %s1966_s2, 96 }
  0x37   :  { %p1679_p10 = scmp.ne.s32.totalorder %s1966_s2, %s1678_s11  ;;  %p1682_p11 = scmp.lt.u32.totalorder %s1678_s11, %s1966_s2 }
  0x39   :  { %p1684_p12 = pnand %p1682_p11, %p1679_p10 }
  0x3b   :  { %1687 = shalt.err (!%p1684_p12)
}
  0x3c   :  { %s1688_s0 = scalar_lea.vmem %s43_s30, 96  ;;  %p1693_p0 = scmp.lt.s32.totalorder %s43_s30, %s43_s30 }
  0x3d   :  { %p1689_p13 = scmp.ne.s32.totalorder %s43_s30, %s1688_s0  ;;  %p1694_p1 = scmp.lt.s32.totalorder %s1688_s0, %s1688_s0 }
  0x3f   :  { %p1695_p2 = por %p1694_p1, %p1693_p0 }
  0x41   :  { %p1696_p3 = pnand %p1695_p2, %p1689_p13 }
  0x43   :  { %1699 = shalt.err (!%p1696_p3)
}
  0x44   :  { %45 = dma.hbm_to_vmem [thread:$0]  %s1966_s2, 96, %s43_s30, [#allocation6]  }
  0x45   :  { %s1700_s18 = scalar_lea.hbm %s1968_s4, 36864 }
  0x46   :  { %p1701_p4 = scmp.ne.s32.totalorder %s1968_s4, %s1700_s18  ;;  %p1704_p5 = scmp.lt.u32.totalorder %s1700_s18, %s1968_s4 }
  0x48   :  { %p1706_p6 = pnand %p1704_p5, %p1701_p4 }
  0x4a   :  { %1709 = shalt.err (!%p1706_p6)
}
  0x4b   :  { %s1710_s23 = scalar_lea.vmem %s62_s7, 36864  ;;  %p1715_p8 = scmp.lt.s32.totalorder %s62_s7, %s62_s7 }
  0x4c   :  { %p1711_p7 = scmp.ne.s32.totalorder %s62_s7, %s1710_s23  ;;  %p1716_p9 = scmp.lt.s32.totalorder %s1710_s23, %s1710_s23 }
  0x4e   :  { %p1717_p10 = por %p1716_p9, %p1715_p8 }
  0x50   :  { %p1718_p11 = pnand %p1717_p10, %p1711_p7 }
  0x52   :  { %1721 = shalt.err (!%p1718_p11)
}
  0x53   :  { %s1759_s2 = smov 384   ;;  %s1760_s24 = smov 24  }
  0x54   :  { %67 = dma.hbm_to_vmem [thread:$0]  %s1968_s4, 36864, %s62_s7, [#allocation9], %s1759_s2, %s1759_s2, %s1760_s24  }
  0x55   :  { %1744 = dma.done.wait [#allocation3], 128  }
  0x56   :  { %1745 = vsyncadd [#allocation3], 4294967168 }
  0x57   :  { %1746 = dma.done.wait [#allocation6], 3168  }
  0x58   :  { %1747 = vsyncadd [#allocation6], 4294964128 }
  0x59   :  { %1748 = dma.done.wait [#allocation9], 36960  }
  0x5a   :  { %1749 = vsyncadd [#allocation9], 4294930336  ;;  %v1761_v0 = vmov 0.0   ;;  %v95_v1 = vld [vmem:[#allocation5 + $0x8] sm:$0xff]  ;;  %v101_v2 = vld [vmem:[#allocation5 + $0x38] sm:$0xff]  ;;  %vm118_vm3 = vcmask 261120  }
  0x5b   :  { %186 = vmatprep.mubr.f32.mxu1 %v1761_v0  ;;  %v94_v3 = vld [vmem:[#allocation5] sm:$0xff]  ;;  %v1272_v4 = vpack.c.bf16 %v101_v2, %v95_v1  ;;  %v100_v5 = vld [vmem:[#allocation5 + $0x30] sm:$0xff]  ;;  %v107_v6 = vld [vmem:[#allocation5 + $0x68] sm:$0xff]  ;;  %s1763_s4 = smov [#allocation11]  }
  0x5c   :  { %v113_v7 = vld [vmem:[#allocation5 + $0x98] sm:$0xff]  ;;  %v1274_v8 = vpack.c.bf16 %v100_v5, %v94_v3  ;;  %v106_v10 = vld [vmem:[#allocation5 + $0x60] sm:$0xff]  ;;  %v112_v11 = vld [vmem:[#allocation5 + $0x90] sm:$0xff]  ;;  %s1135_s27 = sshll.u32 %s1763_s4, 4  ;;  %s1136_s27 = int_to_ptr.vmem [resolvable:$true] %s1135_s27 }
  0x5d   :  { %v1276_v9 = vpack.c.bf16 %v113_v7, %v107_v6  ;;  %v83_v12 = vld [vmem:[#allocation2] sm:$0xff]  ;;  %1273 = vmatprep.subr.bf16.mxu1 %v1272_v4  ;;  %v103_v15 = vld [vmem:[#allocation5 + $0x48] sm:$0xff]  ;;  %v1278_v16 = vpack.c.bf16 %v112_v11, %v106_v10  ;;  %v96_v22 = vld [vmem:[#allocation5 + $0x10] sm:$0xff]  ;;  %s1722_s3 = scalar_lea.vmem %s1136_s27, 384  ;;  %p1727_p13 = scmp.lt.s32.totalorder %s1136_s27, %s1136_s27 }
  0x5e   :  { %vm84_vm0 = vcmp.ge.s32.totalorder %v83_v12, 0  ;;  %vm85_vm1 = vcmp.lt.s32.totalorder %v83_v12, 52  ;;  %v87_v13 = vshra.s32 %v83_v12, 2  ;;  %v97_v14 = vld [vmem:[#allocation5 + $0x18] sm:$0xff]  ;;  %1275 = vmatpush1.bf16.msra.mxu1 %v1274_v8  ;;  %v89_v17 = vand.u32 3, %v83_v12  ;;  %v102_v23 = vld [vmem:[#allocation5 + $0x40] sm:$0xff]  ;;  %p1723_p12 = scmp.ne.s32.totalorder %s1136_s27, %s1722_s3  ;;  %p1728_p0 = scmp.lt.s32.totalorder %s1722_s3, %s1722_s3 }
  0x5f   :  { %vm86_vm2 = vmand %vm84_vm0, %vm85_vm1  ;;  %1277 = vmatprep.subr.bf16.mxu1 %v1276_v9  ;;  %v1280_v19 = vpack.c.bf16 %v103_v15, %v97_v14  ;;  %v109_v24 = vld [vmem:[#allocation5 + $0x78] sm:$0xff]  ;;  %v115_v25 = vld [vmem:[#allocation5 + $0xa8] sm:$0xff]  ;;  %v1282_v30 = vpack.c.bf16 %v102_v23, %v96_v22 }
  0x60   :  { %v88_v18 = vsel %vm86_vm2, %v87_v13, 13  ;;  %v90_v20 = vsel %vm86_vm2, %v89_v17, 4  ;;  %v108_v27 = vld [vmem:[#allocation5 + $0x70] sm:$0xff]  ;;  %v114_v28 = vld [vmem:[#allocation5 + $0xa0] sm:$0xff]  ;;  %v1284_v35 = vpack.c.bf16 %v115_v25, %v109_v24  ;;  %v99_v36 = vld [vmem:[#allocation5 + $0x28] sm:$0xff]  ;;  %p1729_p1 = por %p1728_p0, %p1727_p13 }
  0x61   :  { %v91_v21 = vmul.u32 256, %v88_v18  ;;  %v416_v29 = vld [vmem:[#allocation10 + $0x8] sm:$0xff]  ;;  %v419_v31 = vld [vmem:[#allocation10 + $0x20] sm:$0xff]  ;;  %v418_v33 = vld [vmem:[#allocation10 + $0x18] sm:$0xff]  ;;  %v1286_v47 = vpack.c.bf16 %v114_v28, %v108_v27 }
  0x62   :  { %1279 = vmatpush1.bf16.msra.mxu1 %v1278_v16  ;;  %v415_v32 = vld [vmem:[#allocation10] sm:$0xff]  ;;  %v1296_v37 = vpack.c.bf16 %v419_v31, %v416_v29  ;;  %v422_v39 = vld [vmem:[#allocation10 + $0x38] sm:$0xff]  ;;  %v425_v40 = vld [vmem:[#allocation10 + $0x50] sm:$0xff]  ;;  %p1730_p2 = pnand %p1729_p1, %p1723_p12 }
  0x63   :  { %v92_v26 = vadd.s32 %v91_v21, %v90_v20  ;;  %1281 = vmatprep.subr.bf16.mxu1 %v1280_v19  ;;  %v1298_v38 = vpack.c.bf16 %v418_v33, %v415_v32  ;;  %v105_v41 = vld [vmem:[#allocation5 + $0x58] sm:$0xff]  ;;  %v1300_v42 = vpack.c.bf16 %v425_v40, %v422_v39  ;;  %v431_v46 = vld [vmem:[#allocation10 + $0x80] sm:$0xff]  ;;  %v98_v49 = vld [vmem:[#allocation5 + $0x20] sm:$0xff] }
  0x64   :  { %v421_v43 = vld [vmem:[#allocation10 + $0x30] sm:$0xff]  ;;  %v424_v44 = vld [vmem:[#allocation10 + $0x48] sm:$0xff]  ;;  %1297 = vmatprep.subr.bf16.mxu0 %v1296_v37  ;;  %v1288_v48 = vpack.c.bf16 %v105_v41, %v99_v36  ;;  %v111_v51 = vld [vmem:[#allocation5 + $0x88] sm:$0xff] }
  0x65   :  { %v1855_v34 = vcvt.s32.f32 %v92_v26  ;;  %v428_v45 = vld [vmem:[#allocation10 + $0x68] sm:$0xff]  ;;  %1299 = vmatpush1.bf16.msra.mxu0 %v1298_v38  ;;  %v1302_v52 = vpack.c.bf16 %v424_v44, %v421_v43  ;;  %v427_v55 = vld [vmem:[#allocation10 + $0x60] sm:$0xff]  ;;  %v430_v56 = vld [vmem:[#allocation10 + $0x78] sm:$0xff] }
  0x66   :  { %v104_v50 = vld [vmem:[#allocation5 + $0x50] sm:$0xff]  ;;  %v117_v53 = vld [vmem:[#allocation5 + $0xb8] sm:$0xff]  ;;  %1301 = vmatprep.subr.bf16.mxu0 %v1300_v42  ;;  %v1304_v54 = vpack.c.bf16 %v431_v46, %v428_v45  ;;  %v434_v57 = vld [vmem:[#allocation10 + $0x98] sm:$0xff]  ;;  %v1306_v1 = vpack.c.bf16 %v430_v56, %v427_v55 }
  0x67   :  { %1146 = vmatmul.mubr.msk.f32.vlgmr.msra.gmra.mrb[0].mxu1 %vm118_vm3, %v1855_v34  ;;  %v437_v58 = vld [vmem:[#allocation10 + $0xb0] sm:$0xff]  ;;  %v1290_v59 = vpack.c.bf16 %v104_v50, %v98_v49  ;;  %v1292_v60 = vpack.c.bf16 %v117_v53, %v111_v51  ;;  %v116_v62 = vld [vmem:[#allocation5 + $0xb0] sm:$0xff]  ;;  %v514_v11 = vld [vmem:[#allocation10 + $0x318] sm:$0xff] }
  0x68   :  { %1283 = vmatpush1.bf16.msra.mxu1 %v1282_v30  ;;  %257 = vmatprep.mubr.f32.mxu1 %v1761_v0  ;;  %v110_v61 = vld [vmem:[#allocation5 + $0x80] sm:$0xff]  ;;  %v512_v63 = vld [vmem:[#allocation10 + $0x308] sm:$0xff]  ;;  %v515_v2 = vld [vmem:[#allocation10 + $0x320] sm:$0xff]  ;;  %v1308_v3 = vpack.c.bf16 %v437_v58, %v434_v57 }
  0x69   :  { %1285 = vmatprep.subr.bf16.mxu1 %v1284_v35  ;;  %1303 = vmatpush1.bf16.msra.mxu0 %v1302_v52  ;;  %v433_v4 = vld [vmem:[#allocation10 + $0x90] sm:$0xff]  ;;  %v436_v5 = vld [vmem:[#allocation10 + $0xa8] sm:$0xff]  ;;  %v443_v7 = vld [vmem:[#allocation10 + $0xe0] sm:$0xff]  ;;  %v1294_v8 = vpack.c.bf16 %v116_v62, %v110_v61  ;;  %v1360_v9 = vpack.c.bf16 %v515_v2, %v512_v63 }
  0x6a   :  { %1305 = vmatprep.subr.bf16.mxu0 %v1304_v54  ;;  %v440_v6 = vld [vmem:[#allocation10 + $0xc8] sm:$0xff]  ;;  %v511_v10 = vld [vmem:[#allocation10 + $0x300] sm:$0xff]  ;;  %v518_v12 = vld [vmem:[#allocation10 + $0x338] sm:$0xff]  ;;  %v1310_v13 = vpack.c.bf16 %v436_v5, %v433_v4 }
  0x6b   :  { %v521_v14 = vld [vmem:[#allocation10 + $0x350] sm:$0xff]  ;;  %v1312_v15 = vpack.c.bf16 %v443_v7, %v440_v6  ;;  %v439_v16 = vld [vmem:[#allocation10 + $0xc0] sm:$0xff]  ;;  %v442_v17 = vld [vmem:[#allocation10 + $0xd8] sm:$0xff]  ;;  %v1362_v20 = vpack.c.bf16 %v514_v11, %v511_v10 }
  0x6c   :  { %1287 = vmatpush1.bf16.msra.mxu1 %v1286_v47  ;;  %v446_v18 = vld [vmem:[#allocation10 + $0xf8] sm:$0xff]  ;;  %v449_v19 = vld [vmem:[#allocation10 + $0x110] sm:$0xff]  ;;  %v1364_v21 = vpack.c.bf16 %v521_v14, %v518_v12  ;;  %v520_v22 = vld [vmem:[#allocation10 + $0x348] sm:$0xff]  ;;  %v1314_v24 = vpack.c.bf16 %v442_v17, %v439_v16 }
  0x6d   :  { %1289 = vmatprep.subr.bf16.mxu1 %v1288_v48  ;;  %1307 = vmatpush1.bf16.msra.mxu0 %v1306_v1  ;;  %v524_v23 = vld [vmem:[#allocation10 + $0x368] sm:$0xff]  ;;  %v527_v25 = vld [vmem:[#allocation10 + $0x380] sm:$0xff]  ;;  %v1316_v26 = vpack.c.bf16 %v449_v19, %v446_v18  ;;  %v445_v27 = vld [vmem:[#allocation10 + $0xf0] sm:$0xff] }
  0x6e   :  { %1309 = vmatprep.subr.bf16.mxu0 %v1308_v3  ;;  %v448_v28 = vld [vmem:[#allocation10 + $0x108] sm:$0xff]  ;;  %v455_v30 = vld [vmem:[#allocation10 + $0x140] sm:$0xff]  ;;  %v1368_v32 = vpack.c.bf16 %v527_v25, %v524_v23  ;;  %v526_v35 = vld [vmem:[#allocation10 + $0x378] sm:$0xff] }
  0x6f   :  { %1147 = vmatmul.mubr.msk.f32.vlgmr.msra.gmra.mrb[2].mxu1 %vm118_vm3, %v1855_v34  ;;  %v452_v29 = vld [vmem:[#allocation10 + $0x128] sm:$0xff]  ;;  %v523_v33 = vld [vmem:[#allocation10 + $0x360] sm:$0xff]  ;;  %v530_v36 = vld [vmem:[#allocation10 + $0x398] sm:$0xff]  ;;  %v1318_v37 = vpack.c.bf16 %v448_v28, %v445_v27 }
  0x70   :  { %1291 = vmatpush1.bf16.msra.mxu1 %v1290_v59  ;;  %328 = vmatprep.mubr.f32.mxu1 %v1761_v0  ;;  %v517_v0 = vld [vmem:[#allocation10 + $0x330] sm:$0xff]  ;;  %v1320_v39 = vpack.c.bf16 %v455_v30, %v452_v29  ;;  %v451_v40 = vld [vmem:[#allocation10 + $0x120] sm:$0xff]  ;;  %v454_v41 = vld [vmem:[#allocation10 + $0x138] sm:$0xff] }
  0x71   :  { %1293 = vmatprep.subr.bf16.mxu1 %v1292_v60  ;;  %1311 = vmatpush1.bf16.msra.mxu0 %v1310_v13  ;;  %v1366_v31 = vpack.c.bf16 %v520_v22, %v517_v0  ;;  %v533_v38 = vld [vmem:[#allocation10 + $0x3b0] sm:$0xff]  ;;  %v458_v42 = vld [vmem:[#allocation10 + $0x158] sm:$0xff]  ;;  %v532_v46 = vld [vmem:[#allocation10 + $0x3a8] sm:$0xff]  ;;  %v1322_v48 = vpack.c.bf16 %v454_v41, %v451_v40 }
  0x72   :  { %1313 = vmatprep.subr.bf16.mxu0 %v1312_v15  ;;  %v461_v43 = vld [vmem:[#allocation10 + $0x170] sm:$0xff]  ;;  %v1372_v44 = vpack.c.bf16 %v533_v38, %v530_v36  ;;  %v536_v47 = vld [vmem:[#allocation10 + $0x3c8] sm:$0xff]  ;;  %v539_v49 = vld [vmem:[#allocation10 + $0x3e0] sm:$0xff] }
  0x73   :  { %v529_v45 = vld [vmem:[#allocation10 + $0x390] sm:$0xff]  ;;  %v1324_v50 = vpack.c.bf16 %v461_v43, %v458_v42  ;;  %v460_v52 = vld [vmem:[#allocation10 + $0x168] sm:$0xff]  ;;  %v467_v54 = vld [vmem:[#allocation10 + $0x1a0] sm:$0xff]  ;;  %v1376_v56 = vpack.c.bf16 %v539_v49, %v536_v47 }
  0x74   :  { %1295 = vmatpush1.bf16.msra.mxu1 %v1294_v8  ;;  %v457_v51 = vld [vmem:[#allocation10 + $0x150] sm:$0xff]  ;;  %v464_v53 = vld [vmem:[#allocation10 + $0x188] sm:$0xff]  ;;  %v1374_v55 = vpack.c.bf16 %v532_v46, %v529_v45  ;;  %v535_v57 = vld [vmem:[#allocation10 + $0x3c0] sm:$0xff] }
  0x75   :  { %1361 = vmatprep.subr.bf16.mxu1 %v1360_v9  ;;  %1315 = vmatpush1.bf16.msra.mxu0 %v1314_v24  ;;  %v538_v58 = vld [vmem:[#allocation10 + $0x3d8] sm:$0xff]  ;;  %v1326_v60 = vpack.c.bf16 %v460_v52, %v457_v51  ;;  %v545_v61 = vld [vmem:[#allocation10 + $0x410] sm:$0xff]  ;;  %v1328_v62 = vpack.c.bf16 %v467_v54, %v464_v53  ;;  %v463_v63 = vld [vmem:[#allocation10 + $0x180] sm:$0xff] }
  0x76   :  { %1317 = vmatprep.subr.bf16.mxu0 %v1316_v26  ;;  %v542_v59 = vld [vmem:[#allocation10 + $0x3f8] sm:$0xff]  ;;  %v473_v3 = vld [vmem:[#allocation10 + $0x1d0] sm:$0xff]  ;;  %v1378_v4 = vpack.c.bf16 %v538_v58, %v535_v57  ;;  %v544_v7 = vld [vmem:[#allocation10 + $0x408] sm:$0xff] }
  0x77   :  { %1148 = vmatmul.mubr.msk.f32.vlgmr.msra.gmra.mrb[4].mxu1 %vm118_vm3, %v1855_v34  ;;  %v1370_v34 = vpack.c.bf16 %v526_v35, %v523_v33  ;;  %v466_v1 = vld [vmem:[#allocation10 + $0x198] sm:$0xff]  ;;  %v1380_v5 = vpack.c.bf16 %v545_v61, %v542_v59  ;;  %v541_v6 = vld [vmem:[#allocation10 + $0x3f0] sm:$0xff]  ;;  %v548_v8 = vld [vmem:[#allocation10 + $0x428] sm:$0xff] }
  0x78   :  { %1363 = vmatpush1.bf16.msra.mxu1 %v1362_v20  ;;  %v470_v2 = vld [vmem:[#allocation10 + $0x1b8] sm:$0xff]  ;;  %v1330_v9 = vpack.c.bf16 %v466_v1, %v463_v63  ;;  %v551_v10 = vld [vmem:[#allocation10 + $0x440] sm:$0xff]  ;;  %v469_v12 = vld [vmem:[#allocation10 + $0x1b0] sm:$0xff]  ;;  %v1382_v16 = vpack.c.bf16 %v544_v7, %v541_v6 }
  0x79   :  { %1365 = vmatprep.subr.bf16.mxu1 %v1364_v21  ;;  %1319 = vmatpush1.bf16.msra.mxu0 %v1318_v37  ;;  %v1332_v11 = vpack.c.bf16 %v473_v3, %v470_v2  ;;  %v472_v13 = vld [vmem:[#allocation10 + $0x1c8] sm:$0xff]  ;;  %v479_v15 = vld [vmem:[#allocation10 + $0x200] sm:$0xff]  ;;  %v1384_v17 = vpack.c.bf16 %v551_v10, %v548_v8  ;;  %v550_v19 = vld [vmem:[#allocation10 + $0x438] sm:$0xff] }
  0x7a   :  { %1321 = vmatprep.subr.bf16.mxu0 %v1320_v39  ;;  %v476_v14 = vld [vmem:[#allocation10 + $0x1e8] sm:$0xff]  ;;  %v547_v18 = vld [vmem:[#allocation10 + $0x420] sm:$0xff]  ;;  %v554_v20 = vld [vmem:[#allocation10 + $0x458] sm:$0xff]  ;;  %v1334_v21 = vpack.c.bf16 %v472_v13, %v469_v12 }
  0x7b   :  { %v557_v0 = vld [vmem:[#allocation10 + $0x470] sm:$0xff]  ;;  %v1336_v22 = vpack.c.bf16 %v479_v15, %v476_v14  ;;  %v475_v23 = vld [vmem:[#allocation10 + $0x1e0] sm:$0xff]  ;;  %v478_v24 = vld [vmem:[#allocation10 + $0x1f8] sm:$0xff]  ;;  %v1386_v27 = vpack.c.bf16 %v550_v19, %v547_v18 }
  0x7c   :  { %1367 = vmatpush1.bf16.msra.mxu1 %v1366_v31  ;;  %v482_v25 = vld [vmem:[#allocation10 + $0x218] sm:$0xff]  ;;  %v485_v26 = vld [vmem:[#allocation10 + $0x230] sm:$0xff]  ;;  %v1388_v28 = vpack.c.bf16 %v557_v0, %v554_v20  ;;  %v556_v30 = vld [vmem:[#allocation10 + $0x468] sm:$0xff] }
  0x7d   :  { %1369 = vmatprep.subr.bf16.mxu1 %v1368_v32  ;;  %1323 = vmatpush1.bf16.msra.mxu0 %v1322_v48  ;;  %v553_v29 = vld [vmem:[#allocation10 + $0x450] sm:$0xff]  ;;  %v560_v31 = vld [vmem:[#allocation10 + $0x488] sm:$0xff]  ;;  %v1338_v32 = vpack.c.bf16 %v478_v24, %v475_v23  ;;  %v563_v33 = vld [vmem:[#allocation10 + $0x4a0] sm:$0xff]  ;;  %v1340_v35 = vpack.c.bf16 %v485_v26, %v482_v25 }
  0x7e   :  { %1325 = vmatprep.subr.bf16.mxu0 %v1324_v50  ;;  %v481_v36 = vld [vmem:[#allocation10 + $0x210] sm:$0xff]  ;;  %v484_v37 = vld [vmem:[#allocation10 + $0x228] sm:$0xff]  ;;  %v491_v39 = vld [vmem:[#allocation10 + $0x260] sm:$0xff]  ;;  %v1390_v40 = vpack.c.bf16 %v556_v30, %v553_v29  ;;  %v1392_v41 = vpack.c.bf16 %v563_v33, %v560_v31 }
  0x7f   :  { %v488_v38 = vld [vmem:[#allocation10 + $0x248] sm:$0xff]  ;;  %v559_v42 = vld [vmem:[#allocation10 + $0x480] sm:$0xff]  ;;  %v562_v43 = vld [vmem:[#allocation10 + $0x498] sm:$0xff] }
  0x80   :  { %1371 = vmatpush1.bf16.msra.mxu1 %v1370_v34  ;;  %v566_v34 = vld [vmem:[#allocation10 + $0x4b8] sm:$0xff]  ;;  %v569_v45 = vld [vmem:[#allocation10 + $0x4d0] sm:$0xff]  ;;  %v1344_v46 = vpack.c.bf16 %v491_v39, %v488_v38  ;;  %v487_v47 = vld [vmem:[#allocation10 + $0x240] sm:$0xff]  ;;  %v1394_v51 = vpack.c.bf16 %v562_v43, %v559_v42 }
  0x81   :  { %1373 = vmatprep.subr.bf16.mxu1 %v1372_v44  ;;  %1327 = vmatpush1.bf16.msra.mxu0 %v1326_v60  ;;  %v1342_v44 = vpack.c.bf16 %v484_v37, %v481_v36  ;;  %v490_v48 = vld [vmem:[#allocation10 + $0x258] sm:$0xff]  ;;  %v497_v50 = vld [vmem:[#allocation10 + $0x290] sm:$0xff]  ;;  %v1396_v52 = vpack.c.bf16 %v569_v45, %v566_v34  ;;  %v568_v54 = vld [vmem:[#allocation10 + $0x4c8] sm:$0xff] }
  0x82   :  { %1329 = vmatprep.subr.bf16.mxu0 %v1328_v62  ;;  %v494_v49 = vld [vmem:[#allocation10 + $0x278] sm:$0xff]  ;;  %v565_v53 = vld [vmem:[#allocation10 + $0x4b0] sm:$0xff]  ;;  %v575_v57 = vld [vmem:[#allocation10 + $0x500] sm:$0xff] }
  0x83   :  { %v1348_v58 = vpack.c.bf16 %v497_v50, %v494_v49  ;;  %v1398_v59 = vpack.c.bf16 %v568_v54, %v565_v53  ;;  %v571_v61 = vld [vmem:[#allocation10 + $0x4e0] sm:$0xff]  ;;  %v574_v62 = vld [vmem:[#allocation10 + $0x4f8] sm:$0xff]  ;;  %v581_v1 = vld [vmem:[#allocation10 + $0x530] sm:$0xff] }
  0x84   :  { %1375 = vmatpush1.bf16.msra.mxu1 %v1374_v55  ;;  %v1346_v55 = vpack.c.bf16 %v490_v48, %v487_v47  ;;  %v578_v63 = vld [vmem:[#allocation10 + $0x518] sm:$0xff]  ;;  %v1402_v2 = vpack.c.bf16 %v574_v62, %v571_v61  ;;  %v577_v6 = vld [vmem:[#allocation10 + $0x510] sm:$0xff]  ;;  %v580_v8 = vld [vmem:[#allocation10 + $0x528] sm:$0xff] }
  0x85   :  { %1377 = vmatprep.subr.bf16.mxu1 %v1376_v56  ;;  %1331 = vmatpush1.bf16.msra.mxu0 %v1330_v9  ;;  %v572_v56 = vld [vmem:[#allocation10 + $0x4e8] sm:$0xff]  ;;  %v1404_v3 = vpack.c.bf16 %v581_v1, %v578_v63  ;;  %v1406_v9 = vpack.c.bf16 %v580_v8, %v577_v6  ;;  %v587_v14 = vld [vmem:[#allocation10 + $0x560] sm:$0xff]  ;;  %v586_v20 = vld [vmem:[#allocation10 + $0x558] sm:$0xff] }
  0x86   :  { %1333 = vmatprep.subr.bf16.mxu0 %v1332_v11  ;;  %v1400_v60 = vpack.c.bf16 %v575_v57, %v572_v56  ;;  %v500_v10 = vld [vmem:[#allocation10 + $0x2a8] sm:$0xff]  ;;  %v503_v11 = vld [vmem:[#allocation10 + $0x2c0] sm:$0xff]  ;;  %v506_v0 = vld [vmem:[#allocation10 + $0x2d8] sm:$0xff] }
  0x87   :  { %v584_v12 = vld [vmem:[#allocation10 + $0x548] sm:$0xff]  ;;  %v1352_v13 = vpack.c.bf16 %v503_v11, %v500_v10  ;;  %v499_v15 = vld [vmem:[#allocation10 + $0x2a0] sm:$0xff]  ;;  %v590_v24 = vld [vmem:[#allocation10 + $0x578] sm:$0xff] }
  0x88   :  { %1379 = vmatpush1.bf16.msra.mxu1 %v1378_v4  ;;  %v493_v4 = vld [vmem:[#allocation10 + $0x270] sm:$0xff]  ;;  %v583_v19 = vld [vmem:[#allocation10 + $0x540] sm:$0xff]  ;;  %v592_v31 = vld [vmem:[#allocation10 + $0x588] sm:$0xff] }
  0x89   :  { %1381 = vmatprep.subr.bf16.mxu1 %v1380_v5  ;;  %1335 = vmatpush1.bf16.msra.mxu0 %v1334_v21  ;;  %v496_v5 = vld [vmem:[#allocation10 + $0x288] sm:$0xff]  ;;  %v1410_v21 = vpack.c.bf16 %v586_v20, %v583_v19  ;;  %v593_v25 = vld [vmem:[#allocation10 + $0x590] sm:$0xff]  ;;  %v595_v39 = vld [vmem:[#allocation10 + $0x5a0] sm:$0xff] }
  0x8a   :  { %1337 = vmatprep.subr.bf16.mxu0 %v1336_v22  ;;  %v1350_v7 = vpack.c.bf16 %v496_v5, %v493_v4  ;;  %v509_v22 = vld [vmem:[#allocation10 + $0x2f0] sm:$0xff]  ;;  %v596_v33 = vld [vmem:[#allocation10 + $0x5a8] sm:$0xff]  ;;  %v602_v43 = vld [vmem:[#allocation10 + $0x5d8] sm:$0xff] }
  0x8b   :  { %v1356_v23 = vpack.c.bf16 %v509_v22, %v506_v0  ;;  %v505_v26 = vld [vmem:[#allocation10 + $0x2d0] sm:$0xff]  ;;  %v468_v38 = vld [vmem:[#allocation10 + $0x1a8] sm:$0xff]  ;;  %v611_v49 = vld [vmem:[#allocation10 + $0x620] sm:$0xff] }
  0x8c   :  { %1383 = vmatpush1.bf16.msra.mxu1 %v1382_v16  ;;  %v502_v16 = vld [vmem:[#allocation10 + $0x2b8] sm:$0xff]  ;;  %v589_v29 = vld [vmem:[#allocation10 + $0x570] sm:$0xff]  ;;  %v608_v48 = vld [vmem:[#allocation10 + $0x608] sm:$0xff] }
  0x8d   :  { %1385 = vmatprep.subr.bf16.mxu1 %v1384_v17  ;;  %1339 = vmatpush1.bf16.msra.mxu0 %v1338_v32  ;;  %v1408_v17 = vpack.c.bf16 %v587_v14, %v584_v12  ;;  %v1354_v18 = vpack.c.bf16 %v502_v16, %v499_v15  ;;  %v1414_v32 = vpack.c.bf16 %v592_v31, %v589_v29  ;;  %v465_v36 = vld [vmem:[#allocation10 + $0x190] sm:$0xff]  ;;  %v1872_v62 = vld [vmem:[#allocation8] sm:$0x3f]  ;;  %v420_v6 = vld [vmem:[#allocation10 + $0x28] sm:$0xff] }
  0x8e   :  { %1341 = vmatprep.subr.bf16.mxu0 %v1340_v35  ;;  %v599_v35 = vld [vmem:[#allocation10 + $0x5c0] sm:$0xff]  ;;  %v605_v34 = vld [vmem:[#allocation10 + $0x5f0] sm:$0xff]  ;;  %v1424_v50 = vpack.c.bf16 %v611_v49, %v608_v48  ;;  %v474_v11 = vld [vmem:[#allocation10 + $0x1d8] sm:$0xff] }
  0x8f   :  { %v1416_v37 = vpack.c.bf16 %v599_v35, %v596_v33  ;;  %v601_v45 = vld [vmem:[#allocation10 + $0x5d0] sm:$0xff]  ;;  %v471_v10 = vld [vmem:[#allocation10 + $0x1c0] sm:$0xff]  ;;  %v426_v0 = vld [vmem:[#allocation10 + $0x58] sm:$0xff] }
  0x90   :  { %1387 = vmatpush1.bf16.msra.mxu1 %v1386_v27  ;;  %v1412_v27 = vpack.c.bf16 %v593_v25, %v590_v24  ;;  %v417_v5 = vld [vmem:[#allocation10 + $0x10] sm:$0xff]  ;;  %v1492_v20 = vpack.c.bf16 %v474_v11, %v471_v10  ;;  %v1762_v24 = vmov 1.0   ;;  %v607_v33 = vld [vmem:[#allocation10 + $0x600] sm:$0xff]  ;;  %v610_v35 = vld [vmem:[#allocation10 + $0x618] sm:$0xff] }
  0x91   :  { %1389 = vmatprep.subr.bf16.mxu1 %v1388_v28  ;;  %1343 = vmatpush1.bf16.msra.mxu0 %v1342_v44  ;;  %v508_v28 = vld [vmem:[#allocation10 + $0x2e8] sm:$0xff]  ;;  %v1420_v44 = vpack.c.bf16 %v605_v34, %v602_v43  ;;  %v617_v43 = vld [vmem:[#allocation10 + $0x650] sm:$0xff]  ;;  %v483_v34 = vld [vmem:[#allocation10 + $0x220] sm:$0xff]  ;;  %v1426_v49 = vpack.c.bf16 %v610_v35, %v607_v33 }
  0x92   :  { %1345 = vmatprep.subr.bf16.mxu0 %v1344_v46  ;;  %v1358_v30 = vpack.c.bf16 %v508_v28, %v505_v26  ;;  %v604_v46 = vld [vmem:[#allocation10 + $0x5e8] sm:$0xff]  ;;  %v477_v26 = vld [vmem:[#allocation10 + $0x1f0] sm:$0xff]  ;;  %v498_v19 = vld [vmem:[#allocation10 + $0x298] sm:$0xff] }
  0x93   :  { %v1422_v47 = vpack.c.bf16 %v604_v46, %v601_v45  ;;  %v501_v33 = vld [vmem:[#allocation10 + $0x2b0] sm:$0xff]  ;;  %v504_v35 = vld [vmem:[#allocation10 + $0x2c8] sm:$0xff]  ;;  %v579_v25 = vld [vmem:[#allocation10 + $0x520] sm:$0xff] }
  0x94   :  { %1391 = vmatpush1.bf16.msra.mxu1 %v1390_v40  ;;  %v598_v40 = vld [vmem:[#allocation10 + $0x5b8] sm:$0xff] }
  0x95   :  { %1393 = vmatprep.subr.bf16.mxu1 %v1392_v41  ;;  %1347 = vmatpush1.bf16.msra.mxu0 %v1346_v55  ;;  %v1488_v41 = vpack.c.bf16 %v468_v38, %v465_v36  ;;  %v1418_v42 = vpack.c.bf16 %v598_v40, %v595_v39  ;;  %v1868_v55 = vld [vmem:[#allocation7] sm:$0x3f]  ;;  %v432_v40 = vld [vmem:[#allocation10 + $0x88] sm:$0xff] }
  0x96   :  { %1349 = vmatprep.subr.bf16.mxu0 %v1348_v58  ;;  %v429_v39 = vld [vmem:[#allocation10 + $0x70] sm:$0xff] }
  0x98   :  { %1395 = vmatpush1.bf16.msra.mxu1 %v1394_v51  ;;  %v342_v51 = vlaneseq }
  0x99   :  { %1397 = vmatprep.subr.bf16.mxu1 %v1396_v52  ;;  %1351 = vmatpush1.bf16.msra.mxu0 %v1350_v7 }
  0x9a   :  { %1353 = vmatprep.subr.bf16.mxu0 %v1352_v13  ;;  %v1865_v52 = vshrl.u32 %v342_v51, 7  ;;  %v613_v51 = vld [vmem:[#allocation10 + $0x630] sm:$0xff] }
  0x9c   :  { %1399 = vmatpush1.bf16.msra.mxu1 %v1398_v59  ;;  %v344_v53 = vsub.s32 0, %v1865_v52  ;;  %v348_v56 = vsub.s32 1, %v1865_v52  ;;  %v352_v8 = vsub.s32 2, %v1865_v52  ;;  %v356_v13 = vsub.s32 3, %v1865_v52 }
  0x9d   :  { %1401 = vmatprep.subr.bf16.mxu1 %v1400_v60  ;;  %1355 = vmatpush1.bf16.msra.mxu0 %v1354_v18 }
  0x9e   :  { %1357 = vmatprep.subr.bf16.mxu0 %v1356_v23  ;;  %v345_v61 = vrot.slane %v1868_v55, %v344_v53  ;;  %v349_v1 = vrot.slane %v1868_v55, %v348_v56  ;;  %v380_v4 = vrot.slane %v1872_v62, %v348_v56  ;;  %v353_v23 = vrot.slane %v1868_v55, %v352_v8 }
  0x9f   :  { %v357_v29 = vrot.slane %v1868_v55, %v356_v13  ;;  %v384_v31 = vrot.slane %v1872_v62, %v352_v8  ;;  %v619_v8 = vld [vmem:[#allocation10 + $0x660] sm:$0xff] }
  0xa0   :  { %1403 = vmatpush1.bf16.msra.mxu1 %v1402_v2 }
  0xa1   :  { %1405 = vmatprep.subr.bf16.mxu1 %v1404_v3  ;;  %1359 = vmatpush1.bf16.msra.mxu0 %v1358_v30 }
  0xa2   :  { %1489 = vmatprep.subr.bf16.mxu0 %v1488_v41  ;;  %v614_v41 = vld [vmem:[#allocation10 + $0x638] sm:$0xff] }
  0xa4   :  { %1407 = vmatpush1.bf16.msra.mxu1 %v1406_v9  ;;  %v376_v9 = vrot.slane %v1872_v62, %v344_v53  ;;  %v616_v53 = vld [vmem:[#allocation10 + $0x648] sm:$0xff] }
  0xa5   :  { %1409 = vmatprep.subr.bf16.mxu1 %v1408_v17  ;;  %v1490_v17 = vpack.c.bf16 %v420_v6, %v417_v5  ;;  %v1430_v6 = vpack.c.bf16 %v616_v53, %v613_v51  ;;  %v637_v51 = vld [vmem:[#allocation10 + $0x6f0] sm:$0xff]  ;;  %v640_v53 = vld [vmem:[#allocation10 + $0x708] sm:$0xff] }
  0xa8   :  { %1411 = vmatpush1.bf16.msra.mxu1 %v1410_v21  ;;  %v423_v21 = vld [vmem:[#allocation10 + $0x40] sm:$0xff] }
  0xa9   :  { %1413 = vmatprep.subr.bf16.mxu1 %v1412_v27  ;;  %v480_v27 = vld [vmem:[#allocation10 + $0x208] sm:$0xff] }
  0xaa   :  { %v1496_v38 = vpack.c.bf16 %v480_v27, %v477_v26 }
  0xac   :  { %1415 = vmatpush1.bf16.msra.mxu1 %v1414_v32  ;;  %v1494_v32 = vpack.c.bf16 %v426_v0, %v423_v21 }
  0xad   :  { %1417 = vmatprep.subr.bf16.mxu1 %v1416_v37  ;;  %v388_v37 = vrot.slane %v1872_v62, %v356_v13  ;;  %v444_v13 = vld [vmem:[#allocation10 + $0xe8] sm:$0xff] }
  0xb0   :  { %1419 = vmatpush1.bf16.msra.mxu1 %v1418_v42 }
  0xb1   :  { %1421 = vmatprep.subr.bf16.mxu1 %v1420_v44  ;;  %v486_v44 = vld [vmem:[#allocation10 + $0x238] sm:$0xff] }
  0xb4   :  { %1423 = vmatpush1.bf16.msra.mxu1 %v1422_v47  ;;  %v364_v47 = vsub.s32 5, %v1865_v52 }
  0xb5   :  { %1425 = vmatprep.subr.bf16.mxu1 %v1424_v50  ;;  %v1498_v50 = vpack.c.bf16 %v432_v40, %v429_v39  ;;  %v634_v39 = vld [vmem:[#allocation10 + $0x6d8] sm:$0xff] }
  0xb6   :  { %v365_v5 = vrot.slane %v1868_v55, %v364_v47 }
 0x13a   :  { %v188_v54 = vpop.f32.mrb[0].mxu1 }
 0x13b   :  { %v189_v57 = vadd.f32 0.5, %v188_v54  ;;  %v190_v58 = vpop.f32.mrb[1].mxu1 }
 0x13c   :  { %v191_v59 = vadd.f32 0.5, %v190_v58  ;;  %v1500_v58 = vpack.c.bf16 %v486_v44, %v483_v34  ;;  %v638_v34 = vld [vmem:[#allocation10 + $0x6f8] sm:$0xff]  ;;  %v641_v44 = vld [vmem:[#allocation10 + $0x710] sm:$0xff] }
 0x13d   :  { %v1588_v60 = vtrunc.f32 %v189_v57  ;;  %v1428_v57 = vpack.c.bf16 %v617_v43, %v614_v41  ;;  %v1512_v41 = vpack.c.bf16 %v504_v35, %v501_v33  ;;  %v456_v43 = vld [vmem:[#allocation10 + $0x148] sm:$0xff]  ;;  %v525_v35 = vld [vmem:[#allocation10 + $0x370] sm:$0xff] }
 0x13e   :  { %v1590_v63 = vtrunc.f32 %v191_v59  ;;  %v435_v59 = vld [vmem:[#allocation10 + $0xa0] sm:$0xff] }
 0x13f   :  { %v1589_v2 = vcvt.f32.s32 %v1588_v60  ;;  %v438_v60 = vld [vmem:[#allocation10 + $0xb8] sm:$0xff] }
 0x140   :  { %v1591_v3 = vcvt.f32.s32 %v1590_v63 }
 0x141   :  { %v366_v7 = vand.u32 %v1589_v2, %v345_v61  ;;  %v620_v61 = vld [vmem:[#allocation10 + $0x668] sm:$0xff]  ;;  %v489_v2 = vld [vmem:[#allocation10 + $0x250] sm:$0xff] }
 0x142   :  { %v259_v12 = vpop.f32.mrb[2].mxu1  ;;  %v367_v14 = vand.u32 %v1591_v3, %v349_v1  ;;  %v623_v1 = vld [vmem:[#allocation10 + $0x680] sm:$0xff]  ;;  %v492_v3 = vld [vmem:[#allocation10 + $0x268] sm:$0xff] }
 0x143   :  { %v260_v15 = vadd.f32 0.5, %v259_v12  ;;  %v261_v16 = vpop.f32.mrb[3].mxu1  ;;  %vm1887_vm5 = vcmp.eq.s32.totalorder %v366_v7, %v376_v9  ;;  %v1502_v7 = vpack.c.bf16 %v438_v60, %v435_v59  ;;  %v622_v9 = vld [vmem:[#allocation10 + $0x678] sm:$0xff]  ;;  %v1432_v10 = vpack.c.bf16 %v623_v1, %v620_v61  ;;  %v441_v12 = vld [vmem:[#allocation10 + $0xd0] sm:$0xff]  ;;  %v644_v60 = vld [vmem:[#allocation10 + $0x728] sm:$0xff] }
 0x144   :  { %v262_v18 = vadd.f32 0.5, %v261_v16  ;;  %vm1879_vm4 = vcmp.eq.s32.totalorder %v367_v14, %v380_v4  ;;  %v1504_v11 = vpack.c.bf16 %v492_v3, %v489_v2  ;;  %v626_v14 = vld [vmem:[#allocation10 + $0x698] sm:$0xff]  ;;  %v396_v16 = vrot.slane %v1872_v62, %v364_v47  ;;  %v647_v61 = vld [vmem:[#allocation10 + $0x740] sm:$0xff]  ;;  %v564_v1 = vld [vmem:[#allocation10 + $0x4a8] sm:$0xff] }
 0x145   :  { %v1592_v22 = vtrunc.f32 %v260_v15  ;;  %1155 = vmatprep.mubr.msk.f32.mxu0 %vm1879_vm4, %v1762_v24  ;;  %v1434_v21 = vpack.c.bf16 %v622_v9, %v619_v8  ;;  %v1506_v0 = vpack.c.bf16 %v444_v13, %v441_v12  ;;  %v510_v47 = vld [vmem:[#allocation10 + $0x2f8] sm:$0xff]  ;;  %v1446_v2 = vpack.c.bf16 %v640_v53, %v637_v51  ;;  %v513_v8 = vld [vmem:[#allocation10 + $0x310] sm:$0xff]  ;;  %v516_v9 = vld [vmem:[#allocation10 + $0x328] sm:$0xff] }
 0x146   :  { %v1594_v28 = vtrunc.f32 %v262_v18  ;;  %1156 = vmatmul.mubr.msk.f32.vlgmr.msra.gmra.mrb[0].mxu0 %vm1887_vm5, %v1762_v24  ;;  %v495_v18 = vld [vmem:[#allocation10 + $0x280] sm:$0xff]  ;;  %v462_v59 = vld [vmem:[#allocation10 + $0x178] sm:$0xff]  ;;  %v588_v51 = vld [vmem:[#allocation10 + $0x568] sm:$0xff] }
 0x147   :  { %v1593_v30 = vcvt.f32.s32 %v1592_v22  ;;  %1491 = vmatpush3.bf16.msra.mxu0 %v1490_v17  ;;  %1161 = vmatprep.mubr.msk.f32.mxu0 %vm1879_vm4, %v1762_v24  ;;  %v629_v17 = vld [vmem:[#allocation10 + $0x6b0] sm:$0xff]  ;;  %v1508_v27 = vpack.c.bf16 %v498_v19, %v495_v18  ;;  %v567_v12 = vld [vmem:[#allocation10 + $0x4c0] sm:$0xff]  ;;  %v570_v13 = vld [vmem:[#allocation10 + $0x4d8] sm:$0xff] }
 0x148   :  { %v1595_v36 = vcvt.f32.s32 %v1594_v28  ;;  %1493 = vmatprep.subr.bf16.mxu0 %v1492_v20  ;;  %v625_v22 = vld [vmem:[#allocation10 + $0x690] sm:$0xff]  ;;  %v1436_v26 = vpack.c.bf16 %v629_v17, %v626_v14  ;;  %v447_v28 = vld [vmem:[#allocation10 + $0x100] sm:$0xff]  ;;  %v652_v17 = vld [vmem:[#allocation10 + $0x768] sm:$0xff] }
 0x149   :  { %v368_v42 = vand.u32 %v1593_v30, %v353_v23  ;;  %v628_v23 = vld [vmem:[#allocation10 + $0x6a8] sm:$0xff]  ;;  %v519_v19 = vld [vmem:[#allocation10 + $0x340] sm:$0xff] }
 0x14a   :  { %v369_v45 = vand.u32 %v1595_v36, %v357_v29  ;;  %v1900_v46 = vpop.f32.mrb[4].mxu1  ;;  %v450_v29 = vld [vmem:[#allocation10 + $0x118] sm:$0xff]  ;;  %v632_v30 = vld [vmem:[#allocation10 + $0x6c8] sm:$0xff]  ;;  %v1438_v36 = vpack.c.bf16 %v628_v23, %v625_v22  ;;  %v659_v22 = vld [vmem:[#allocation10 + $0x7a0] sm:$0xff] }
 0x14b   :  { %vm1903_vm6 = vcmp.eq.s32.totalorder %v368_v42, %v384_v31  ;;  %1495 = vmatpush3.bf16.msra.mxu0 %v1494_v32  ;;  %v332_v54 = vpop.f32.mrb[5].mxu1  ;;  %v635_v32 = vld [vmem:[#allocation10 + $0x6e0] sm:$0xff]  ;;  %v453_v42 = vld [vmem:[#allocation10 + $0x130] sm:$0xff] }
 0x14c   :  { %vm1907_vm7 = vcmp.eq.s32.totalorder %v369_v45, %v388_v37  ;;  %1497 = vmatprep.subr.bf16.mxu0 %v1496_v38  ;;  %v333_v63 = vadd.f32 0.5, %v332_v54  ;;  %v1510_v37 = vpack.c.bf16 %v450_v29, %v447_v28  ;;  %v631_v38 = vld [vmem:[#allocation10 + $0x6c0] sm:$0xff]  ;;  %v1440_v40 = vpack.c.bf16 %v635_v32, %v632_v30  ;;  %v573_v23 = vld [vmem:[#allocation10 + $0x4f0] sm:$0xff]  ;;  %v658_v30 = vld [vmem:[#allocation10 + $0x798] sm:$0xff] }
 0x14d   :  { %1157 = vmatprep.mubr.msk.f32.mxu1 %vm1907_vm7, %v1762_v24  ;;  %v507_v45 = vld [vmem:[#allocation10 + $0x2e0] sm:$0xff]  ;;  %v1444_v54 = vpack.c.bf16 %v641_v44, %v638_v34 }
 0x14e   :  { %1158 = vmatmul.mubr.msk.f32.vlgmr.msra.gmra.mrb[6].mxu1 %vm1903_vm6, %v1762_v24  ;;  %v1598_v4 = vtrunc.f32 %v333_v63  ;;  %v561_v63 = vld [vmem:[#allocation10 + $0x490] sm:$0xff]  ;;  %v655_v29 = vld [vmem:[#allocation10 + $0x780] sm:$0xff] }
 0x14f   :  { %1427 = vmatpush1.bf16.msra.mxu1 %v1426_v49  ;;  %1499 = vmatpush3.bf16.msra.mxu0 %v1498_v50  ;;  %v1442_v49 = vpack.c.bf16 %v634_v39, %v631_v38  ;;  %v1514_v50 = vpack.c.bf16 %v456_v43, %v453_v42  ;;  %v665_v38 = vld [vmem:[#allocation10 + $0x7d0] sm:$0xff]  ;;  %v582_v39 = vld [vmem:[#allocation10 + $0x538] sm:$0xff]  ;;  %v664_v43 = vld [vmem:[#allocation10 + $0x7c8] sm:$0xff] }
 0x150   :  { %1429 = vmatprep.subr.bf16.mxu1 %v1428_v57  ;;  %1501 = vmatprep.subr.bf16.mxu0 %v1500_v58  ;;  %v1599_v15 = vcvt.f32.s32 %v1598_v4  ;;  %v1516_v57 = vpack.c.bf16 %v510_v47, %v507_v45  ;;  %v459_v58 = vld [vmem:[#allocation10 + $0x160] sm:$0xff]  ;;  %v661_v42 = vld [vmem:[#allocation10 + $0x7b0] sm:$0xff]  ;;  %v1532_v34 = vpack.c.bf16 %v582_v39, %v579_v25  ;;  %v534_v45 = vld [vmem:[#allocation10 + $0x3b8] sm:$0xff] }
 0x151   :  { %v1518_v3 = vpack.c.bf16 %v462_v59, %v459_v58  ;;  %v643_v4 = vld [vmem:[#allocation10 + $0x720] sm:$0xff]  ;;  %v668_v47 = vld [vmem:[#allocation10 + $0x7e8] sm:$0xff]  ;;  %v1462_v53 = vpack.c.bf16 %v664_v43, %v661_v42  ;;  %v670_v58 = vld [vmem:[#allocation10 + $0x7f8] sm:$0xff] }
 0x152   :  { %v371_v20 = vand.u32 %v1599_v15, %v365_v5  ;;  %v1448_v5 = vpack.c.bf16 %v647_v61, %v644_v60  ;;  %v1522_v15 = vpack.c.bf16 %v516_v9, %v513_v8  ;;  %v531_v44 = vld [vmem:[#allocation10 + $0x3a0] sm:$0xff]  ;;  %v537_v61 = vld [vmem:[#allocation10 + $0x3d0] sm:$0xff]  ;;  %v676_v8 = vld [vmem:[#allocation10 + $0x828] sm:$0xff] }
 0x153   :  { %1431 = vmatpush1.bf16.msra.mxu1 %v1430_v6  ;;  %1503 = vmatpush3.bf16.msra.mxu0 %v1502_v7  ;;  %v1520_v6 = vpack.c.bf16 %v564_v1, %v561_v63  ;;  %v646_v7 = vld [vmem:[#allocation10 + $0x738] sm:$0xff]  ;;  %v540_v63 = vld [vmem:[#allocation10 + $0x3e8] sm:$0xff]  ;;  %v555_v25 = vld [vmem:[#allocation10 + $0x460] sm:$0xff] }
 0x154   :  { %1433 = vmatprep.subr.bf16.mxu1 %v1432_v10  ;;  %1505 = vmatprep.subr.bf16.mxu0 %v1504_v11  ;;  %vm1919_vm8 = vcmp.eq.s32.totalorder %v371_v20, %v396_v16  ;;  %v650_v10 = vld [vmem:[#allocation10 + $0x758] sm:$0xff]  ;;  %v653_v11 = vld [vmem:[#allocation10 + $0x770] sm:$0xff]  ;;  %v1450_v14 = vpack.c.bf16 %v646_v7, %v643_v4  ;;  %v660_v43 = vld [vmem:[#allocation10 + $0x7a8] sm:$0xff] }
 0x155   :  { %1159 = vmatprep.mubr.msk.f32.mxu1 %vm1919_vm8, %v1762_v24  ;;  %v649_v16 = vld [vmem:[#allocation10 + $0x750] sm:$0xff]  ;;  %v1452_v18 = vpack.c.bf16 %v653_v11, %v650_v10  ;;  %v522_v20 = vld [vmem:[#allocation10 + $0x358] sm:$0xff]  ;;  %v543_v11 = vld [vmem:[#allocation10 + $0x400] sm:$0xff] }
 0x156   :  { %v1526_v28 = vpack.c.bf16 %v522_v20, %v519_v19  ;;  %v674_v1 = vld [vmem:[#allocation10 + $0x818] sm:$0xff]  ;;  %v673_v7 = vld [vmem:[#allocation10 + $0x810] sm:$0xff]  ;;  %v679_v19 = vld [vmem:[#allocation10 + $0x840] sm:$0xff] }
 0x157   :  { %1435 = vmatpush1.bf16.msra.mxu1 %v1434_v21  ;;  %1507 = vmatpush3.bf16.msra.mxu0 %v1506_v0  ;;  %v656_v21 = vld [vmem:[#allocation10 + $0x788] sm:$0xff]  ;;  %v1524_v0 = vpack.c.bf16 %v570_v13, %v567_v12  ;;  %v594_v4 = vld [vmem:[#allocation10 + $0x598] sm:$0xff]  ;;  %v657_v42 = vld [vmem:[#allocation10 + $0x790] sm:$0xff] }
 0x158   :  { %1437 = vmatprep.subr.bf16.mxu1 %v1436_v26  ;;  %1509 = vmatprep.subr.bf16.mxu0 %v1508_v27  ;;  %v576_v26 = vld [vmem:[#allocation10 + $0x508] sm:$0xff]  ;;  %v1454_v27 = vpack.c.bf16 %v652_v17, %v649_v16  ;;  %v1456_v32 = vpack.c.bf16 %v659_v22, %v656_v21  ;;  %v546_v12 = vld [vmem:[#allocation10 + $0x418] sm:$0xff]  ;;  %v1470_v17 = vpack.c.bf16 %v676_v8, %v673_v7  ;;  %v549_v22 = vld [vmem:[#allocation10 + $0x430] sm:$0xff] }
 0x159   :  { %v1528_v33 = vpack.c.bf16 %v576_v26, %v573_v23  ;;  %v680_v13 = vld [vmem:[#allocation10 + $0x848] sm:$0xff]  ;;  %v682_v20 = vld [vmem:[#allocation10 + $0x858] sm:$0xff]  ;;  %v669_v7 = vld [vmem:[#allocation10 + $0x7f0] sm:$0xff] }
 0x15a   :  { %v600_v16 = vld [vmem:[#allocation10 + $0x5c8] sm:$0xff]  ;;  %v686_v26 = vld [vmem:[#allocation10 + $0x878] sm:$0xff] }
 0x15b   :  { %1439 = vmatpush1.bf16.msra.mxu1 %v1438_v36  ;;  %1511 = vmatpush3.bf16.msra.mxu0 %v1510_v37  ;;  %v528_v36 = vld [vmem:[#allocation10 + $0x388] sm:$0xff]  ;;  %v662_v37 = vld [vmem:[#allocation10 + $0x7b8] sm:$0xff] }
 0x15c   :  { %1441 = vmatprep.subr.bf16.mxu1 %v1440_v40  ;;  %1513 = vmatprep.subr.bf16.mxu0 %v1512_v41  ;;  %v1458_v40 = vpack.c.bf16 %v658_v30, %v655_v29  ;;  %v1530_v41 = vpack.c.bf16 %v528_v36, %v525_v35  ;;  %v1460_v56 = vpack.c.bf16 %v665_v38, %v662_v37  ;;  %v552_v23 = vld [vmem:[#allocation10 + $0x448] sm:$0xff]  ;;  %v606_v29 = vld [vmem:[#allocation10 + $0x5f8] sm:$0xff]  ;;  %v685_v35 = vld [vmem:[#allocation10 + $0x870] sm:$0xff] }
 0x15d   :  { %v1474_v30 = vpack.c.bf16 %v682_v20, %v679_v19  ;;  %v688_v36 = vld [vmem:[#allocation10 + $0x888] sm:$0xff]  ;;  %v558_v39 = vld [vmem:[#allocation10 + $0x478] sm:$0xff]  ;;  %v681_v20 = vld [vmem:[#allocation10 + $0x850] sm:$0xff] }
 0x15e   :  { %v672_v8 = vld [vmem:[#allocation10 + $0x808] sm:$0xff]  ;;  %v630_v19 = vld [vmem:[#allocation10 + $0x6b8] sm:$0xff] }
 0x15f   :  { %1443 = vmatpush1.bf16.msra.mxu1 %v1442_v49  ;;  %1515 = vmatpush3.bf16.msra.mxu0 %v1514_v50  ;;  %v671_v49 = vld [vmem:[#allocation10 + $0x800] sm:$0xff]  ;;  %v585_v50 = vld [vmem:[#allocation10 + $0x550] sm:$0xff] }
 0x160   :  { %1445 = vmatprep.subr.bf16.mxu1 %v1444_v54  ;;  %1517 = vmatprep.subr.bf16.mxu0 %v1516_v57  ;;  %v1534_v54 = vpack.c.bf16 %v534_v45, %v531_v44  ;;  %v667_v57 = vld [vmem:[#allocation10 + $0x7e0] sm:$0xff]  ;;  %v1464_v59 = vpack.c.bf16 %v671_v49, %v668_v47  ;;  %v1536_v60 = vpack.c.bf16 %v588_v51, %v585_v50  ;;  %v694_v47 = vld [vmem:[#allocation10 + $0x8b8] sm:$0xff]  ;;  %v609_v51 = vld [vmem:[#allocation10 + $0x610] sm:$0xff] }
 0x161   :  { %v1478_v44 = vpack.c.bf16 %v688_v36, %v685_v35  ;;  %v1550_v45 = vpack.c.bf16 %v558_v39, %v555_v25  ;;  %v1552_v50 = vpack.c.bf16 %v660_v43, %v657_v42  ;;  %v696_v35 = vld [vmem:[#allocation10 + $0x8c8] sm:$0xff]  ;;  %v699_v39 = vld [vmem:[#allocation10 + $0x8e0] sm:$0xff] }
 0x162   :  { %v648_v25 = vld [vmem:[#allocation10 + $0x748] sm:$0xff]  ;;  %v651_v43 = vld [vmem:[#allocation10 + $0x760] sm:$0xff] }
 0x163   :  { %1447 = vmatpush1.bf16.msra.mxu1 %v1446_v2  ;;  %1519 = vmatpush3.bf16.msra.mxu0 %v1518_v3  ;;  %v677_v2 = vld [vmem:[#allocation10 + $0x830] sm:$0xff]  ;;  %v591_v3 = vld [vmem:[#allocation10 + $0x580] sm:$0xff] }
 0x164   :  { %1449 = vmatprep.subr.bf16.mxu1 %v1448_v5  ;;  %1521 = vmatprep.subr.bf16.mxu0 %v1520_v6  ;;  %v1466_v5 = vpack.c.bf16 %v670_v58, %v667_v57  ;;  %v1538_v6 = vpack.c.bf16 %v540_v63, %v537_v61  ;;  %v1468_v9 = vpack.c.bf16 %v677_v2, %v674_v1  ;;  %v701_v57 = vld [vmem:[#allocation10 + $0x8f0] sm:$0xff]  ;;  %v663_v58 = vld [vmem:[#allocation10 + $0x7c0] sm:$0xff] }
 0x165   :  { %v1540_v10 = vpack.c.bf16 %v594_v4, %v591_v3  ;;  %v697_v1 = vld [vmem:[#allocation10 + $0x8d0] sm:$0xff]  ;;  %v700_v4 = vld [vmem:[#allocation10 + $0x8e8] sm:$0xff] }
 0x166   :  { %1162 = vmatmul.mubr.msk.f32.vlgmr.msra.gmra.mrb[2].mxu0 %vm1887_vm5, %v1762_v24 }
 0x167   :  { %1451 = vmatpush1.bf16.msra.mxu1 %v1450_v14  ;;  %1523 = vmatpush3.bf16.msra.mxu0 %v1522_v15  ;;  %v683_v14 = vld [vmem:[#allocation10 + $0x860] sm:$0xff]  ;;  %v597_v15 = vld [vmem:[#allocation10 + $0x5b0] sm:$0xff] }
 0x168   :  { %1163 = vmatprep.mubr.msk.f32.mxu0 %vm1907_vm7, %v1762_v24  ;;  %1453 = vmatprep.subr.bf16.mxu1 %v1452_v18  ;;  %v1542_v18 = vpack.c.bf16 %v546_v12, %v543_v11  ;;  %v1472_v21 = vpack.c.bf16 %v683_v14, %v680_v13  ;;  %v1560_v12 = vpack.c.bf16 %v672_v8, %v669_v7  ;;  %v621_v13 = vld [vmem:[#allocation10 + $0x670] sm:$0xff]  ;;  %v624_v14 = vld [vmem:[#allocation10 + $0x688] sm:$0xff] }
 0x169   :  { %1525 = vmatprep.subr.bf16.mxu0 %v1524_v0  ;;  %v1544_v0 = vpack.c.bf16 %v600_v16, %v597_v15  ;;  %v675_v15 = vld [vmem:[#allocation10 + $0x820] sm:$0xff]  ;;  %v678_v16 = vld [vmem:[#allocation10 + $0x838] sm:$0xff]  ;;  %v1562_v48 = vpack.c.bf16 %v624_v14, %v621_v13 }
 0x16b   :  { %1455 = vmatpush1.bf16.msra.mxu1 %v1454_v27  ;;  %1527 = vmatpush3.bf16.msra.mxu0 %v1526_v28  ;;  %v689_v27 = vld [vmem:[#allocation10 + $0x890] sm:$0xff]  ;;  %v603_v28 = vld [vmem:[#allocation10 + $0x5e0] sm:$0xff] }
 0x16c   :  { %1457 = vmatprep.subr.bf16.mxu1 %v1456_v32  ;;  %1529 = vmatprep.subr.bf16.mxu0 %v1528_v33  ;;  %v1546_v32 = vpack.c.bf16 %v552_v23, %v549_v22  ;;  %v331_v33 = vadd.f32 0.5, %v1900_v46  ;;  %v1476_v37 = vpack.c.bf16 %v689_v27, %v686_v26  ;;  %v1548_v38 = vpack.c.bf16 %v606_v29, %v603_v28  ;;  %v691_v46 = vld [vmem:[#allocation10 + $0x8a0] sm:$0xff]  ;;  %v633_v22 = vld [vmem:[#allocation10 + $0x6d0] sm:$0xff]  ;;  %v636_v23 = vld [vmem:[#allocation10 + $0x6e8] sm:$0xff] }
 0x16d   :  { %v687_v26 = vld [vmem:[#allocation10 + $0x880] sm:$0xff]  ;;  %v690_v27 = vld [vmem:[#allocation10 + $0x898] sm:$0xff]  ;;  %v1570_v28 = vpack.c.bf16 %v636_v23, %v633_v22 }
 0x16e   :  { %v1572_v29 = vpack.c.bf16 %v690_v27, %v687_v26 }
 0x16f   :  { %1459 = vmatpush1.bf16.msra.mxu1 %v1458_v40  ;;  %1531 = vmatpush3.bf16.msra.mxu0 %v1530_v41  ;;  %v692_v40 = vld [vmem:[#allocation10 + $0x8a8] sm:$0xff]  ;;  %v695_v41 = vld [vmem:[#allocation10 + $0x8c0] sm:$0xff] }
 0x170   :  { %1461 = vmatprep.subr.bf16.mxu1 %v1460_v56  ;;  %1533 = vmatprep.subr.bf16.mxu0 %v1532_v34  ;;  %v1596_v56 = vtrunc.f32 %v331_v33  ;;  %v360_v34 = vsub.s32 4, %v1865_v52  ;;  %v1480_v49 = vpack.c.bf16 %v695_v41, %v692_v40  ;;  %v1482_v52 = vpack.c.bf16 %v694_v47, %v691_v46  ;;  %v693_v33 = vld [vmem:[#allocation10 + $0x8b0] sm:$0xff]  ;;  %v702_v40 = vld [vmem:[#allocation10 + $0x8f8] sm:$0xff] }
 0x171   :  { %v1580_v42 = vpack.c.bf16 %v702_v40, %v699_v39 }
 0x172   :  { %v361_v61 = vrot.slane %v1868_v55, %v360_v34 }
 0x173   :  { %1463 = vmatpush1.bf16.msra.mxu1 %v1462_v53  ;;  %1535 = vmatpush3.bf16.msra.mxu0 %v1534_v54  ;;  %v612_v53 = vld [vmem:[#allocation10 + $0x628] sm:$0xff]  ;;  %v698_v54 = vld [vmem:[#allocation10 + $0x8d8] sm:$0xff] }
 0x174   :  { %1465 = vmatprep.subr.bf16.mxu1 %v1464_v59  ;;  %1537 = vmatprep.subr.bf16.mxu0 %v1536_v60  ;;  %v666_v59 = vld [vmem:[#allocation10 + $0x7d8] sm:$0xff]  ;;  %v1597_v60 = vcvt.f32.s32 %v1596_v56  ;;  %v1554_v63 = vpack.c.bf16 %v612_v53, %v609_v51  ;;  %v1484_v2 = vpack.c.bf16 %v701_v57, %v698_v54 }
 0x175   :  { %v1556_v3 = vpack.c.bf16 %v666_v59, %v663_v58  ;;  %v654_v56 = vld [vmem:[#allocation10 + $0x778] sm:$0xff] }
 0x176   :  { %v370_v55 = vand.u32 %v1597_v60, %v361_v61 }
 0x177   :  { %1467 = vmatpush1.bf16.msra.mxu1 %v1466_v5  ;;  %1539 = vmatpush3.bf16.msra.mxu0 %v1538_v6  ;;  %v615_v5 = vld [vmem:[#allocation10 + $0x640] sm:$0xff]  ;;  %v618_v6 = vld [vmem:[#allocation10 + $0x658] sm:$0xff] }
 0x178   :  { %1469 = vmatprep.subr.bf16.mxu1 %v1468_v9  ;;  %1541 = vmatprep.subr.bf16.mxu0 %v1540_v10  ;;  %v392_v9 = vrot.slane %v1872_v62, %v360_v34  ;;  %v1486_v10 = vpack.c.bf16 %v700_v4, %v697_v1  ;;  %v1558_v11 = vpack.c.bf16 %v618_v6, %v615_v5 }
 0x179   :  { %v1582_v34 = vpack.c.bf16 %v654_v56, %v651_v43 }
 0x17a   :  { %vm1942_vm9 = vcmp.eq.s32.totalorder %v370_v55, %v392_v9 }
 0x17b   :  { %1471 = vmatpush1.bf16.msra.mxu1 %v1470_v17  ;;  %1543 = vmatpush3.bf16.msra.mxu0 %v1542_v18  ;;  %v1564_v17 = vpack.c.bf16 %v678_v16, %v675_v15  ;;  %v627_v18 = vld [vmem:[#allocation10 + $0x6a0] sm:$0xff] }
 0x17c   :  { %1473 = vmatprep.subr.bf16.mxu1 %v1472_v21  ;;  %1545 = vmatprep.subr.bf16.mxu0 %v1544_v0  ;;  %v684_v21 = vld [vmem:[#allocation10 + $0x868] sm:$0xff]  ;;  %v1566_v31 = vpack.c.bf16 %v630_v19, %v627_v18 }
 0x17d   :  { %v1568_v0 = vpack.c.bf16 %v684_v21, %v681_v20 }
 0x17f   :  { %1475 = vmatpush1.bf16.msra.mxu1 %v1474_v30  ;;  %1547 = vmatpush3.bf16.msra.mxu0 %v1546_v32  ;;  %v639_v30 = vld [vmem:[#allocation10 + $0x700] sm:$0xff]  ;;  %v642_v32 = vld [vmem:[#allocation10 + $0x718] sm:$0xff] }
 0x180   :  { %1477 = vmatprep.subr.bf16.mxu1 %v1476_v37  ;;  %1549 = vmatprep.subr.bf16.mxu0 %v1548_v38  ;;  %v1574_v36 = vpack.c.bf16 %v642_v32, %v639_v30  ;;  %v1576_v37 = vpack.c.bf16 %v696_v35, %v693_v33  ;;  %v645_v38 = vld [vmem:[#allocation10 + $0x730] sm:$0xff] }
 0x181   :  { %v1578_v41 = vpack.c.bf16 %v648_v25, %v645_v38 }
 0x183   :  { %1479 = vmatpush1.bf16.msra.mxu1 %v1478_v44  ;;  %1551 = vmatpush3.bf16.msra.mxu0 %v1550_v45 }
 0x184   :  { %1481 = vmatprep.subr.bf16.mxu1 %v1480_v49  ;;  %1553 = vmatprep.subr.bf16.mxu0 %v1552_v50 }
 0x186   :  { %1164 = vmatmul.mubr.msk.f32.vlgmr.msra.gmra.mrb[4].mxu0 %vm1903_vm6, %v1762_v24 }
 0x187   :  { %1483 = vmatpush1.bf16.msra.mxu1 %v1482_v52  ;;  %1555 = vmatpush3.bf16.msra.mxu0 %v1554_v63 }
 0x188   :  { %1485 = vmatprep.subr.bf16.mxu1 %v1484_v2  ;;  %1557 = vmatprep.subr.bf16.mxu0 %v1556_v3 }
 0x189   :  { %1165 = vmatprep.mubr.msk.f32.mxu0 %vm1919_vm8, %v1762_v24 }
 0x18b   :  { %1487 = vmatpush1.bf16.msra.mxu1 %v1486_v10  ;;  %1559 = vmatpush3.bf16.msra.mxu0 %v1558_v11 }
 0x18c   :  { %1561 = vmatprep.subr.bf16.mxu0 %v1560_v12 }
 0x18e   :  { %1160 = vmatmul.mubr.msk.f32.vlgmr.msra.gmra.mrb[6].mxu1 %vm1942_vm9, %v1762_v24 }
 0x18f   :  { %1563 = vmatpush3.bf16.msra.mxu0 %v1562_v48 }
 0x190   :  { %1565 = vmatprep.subr.bf16.mxu0 %v1564_v17 }
 0x193   :  { %1567 = vmatpush3.bf16.msra.mxu0 %v1566_v31 }
 0x194   :  { %1569 = vmatprep.subr.bf16.mxu0 %v1568_v0 }
 0x197   :  { %1571 = vmatpush3.bf16.msra.mxu0 %v1570_v28 }
 0x198   :  { %1573 = vmatprep.subr.bf16.mxu0 %v1572_v29 }
 0x19b   :  { %1575 = vmatpush3.bf16.msra.mxu0 %v1574_v36 }
 0x19c   :  { %1577 = vmatprep.subr.bf16.mxu0 %v1576_v37 }
 0x19f   :  { %1579 = vmatpush3.bf16.msra.mxu0 %v1578_v41 }
 0x1a0   :  { %1581 = vmatprep.subr.bf16.mxu0 %v1580_v42 }
 0x1a3   :  { %1583 = vmatpush3.bf16.msra.mxu0 %v1582_v34 }
 0x1a6   :  { %1166 = vmatmul.mubr.msk.f32.vlgmr.msra.gmra.mrb[6].mxu0 %vm1942_vm9, %v1762_v24 }
 0x219   :  { %v769_v44 = vpop.f32.mrb[0].mxu0 }
 0x21a   :  { %v771_v45 = vpop.f32.mrb[1].mxu0 }
 0x239   :  { %v1199_v46 = vpop.f32.mrb[2].mxu0 }
 0x23a   :  { %v1200_v47 = vpop.f32.mrb[3].mxu0 }
 0x23b   :  { %v1201_v49 = vadd.f32 %v1200_v47, %v1199_v46 }
 0x259   :  { %v1234_v50 = vpop.f32.mrb[4].mxu0 }
 0x25a   :  { %v1235_v51 = vpop.f32.mrb[5].mxu0 }
 0x25b   :  { %v1236_v53 = vadd.f32 %v1235_v51, %v1234_v50 }
 0x25d   :  { %v1053_v54 = vadd.f32 %v1236_v53, %v1201_v49 }
 0x261   :  { %v911_v57 = vpop.f32.mrb[6].mxu1 }
 0x262   :  { %v1584_v58 = vadd.f32 %v911_v57, %v769_v44  ;;  %v913_v59 = vpop.f32.mrb[7].mxu1 }
 0x263   :  { %v1585_v60 = vadd.f32 %v913_v59, %v771_v45 }
 0x264   :  { %1126 = vst [vmem:[#allocation11] sm:$0xff] %v1584_v58 }
 0x265   :  { %1127 = vst [vmem:[#allocation11 + $0x8] sm:$0xff] %v1585_v60 }
 0x279   :  { %v1269_v61 = vpop.f32.mrb[6].mxu0 }
 0x27a   :  { %v1270_v52 = vpop.f32.mrb[7].mxu0 }
 0x27b   :  { %v1271_v24 = vadd.f32 %v1270_v52, %v1269_v61 }
 0x27d   :  { %v1123_v63 = vadd.f32 %v1271_v24, %v1053_v54 }
 0x27f   :  { %1128 = vst [vmem:[#allocation11 + $0x10] sm:$0xff] %v1123_v63 }
 0x280   :  { %1733 = shalt.err (!%p1730_p2)
}
 0x281   :  { %s1734_s30 = scalar_lea.hbm %s1969_s5, 384 }
 0x282   :  { %p1735_p3 = scmp.ne.s32.totalorder %s1969_s5, %s1734_s30  ;;  %p1738_p4 = scmp.lt.u32.totalorder %s1734_s30, %s1969_s5 }
 0x284   :  { %p1740_p5 = pnand %p1738_p4, %p1735_p3 }
 0x286   :  { %1743 = shalt.err (!%p1740_p5)
}
 0x287   :  { %1138 = dma.vmem_to_hbm [thread:$0]  %s1136_s27, 384, %s1969_s5, [#allocation4]  }
 0x288   :  { %1750 = dma.done.wait [#allocation4], 384  }
 0x289   :  { %1751 = vsyncadd [#allocation4], 4294966912 }
 0x28a   :  { %1142 = vsyncpa [#allocation3], 1 }
 0x28b   :  { %1143 = vsyncpa [#allocation6], 1 }
 0x28c   :  { %1144 = vsyncpa [#allocation9], 1 }
 0x28d   :  { %1145 = vsyncpa [#allocation4], 1 }

</bundles_post_ra>
